<compile_context>
chip_gen: v6e
topology: v6e:2x2x1
jax: 0.10.0
libtpu: 0.0.40
codegen_flags: <defaults>
</compile_context>

<pallas_src>
import functools

import jax
import jax.numpy as jnp
from jax import lax
from jax.experimental import pallas as pl
from jax.experimental.pallas import tpu as pltpu


def _round_up(x, m):
    return (x + m - 1) // m * m


# ---------------------------------------------------------------------------
# weight folding: dw * pw * BN-scale merged in f32, cast to bf16 once
# ---------------------------------------------------------------------------
def _fold_weights(w_dw, w_pw, gamma, beta, mean, var, eps):
    C = w_dw.shape[0]
    COUT = w_pw.shape[0]
    KH, KW = int(w_dw.shape[1]), int(w_dw.shape[2])
    scale = gamma / jnp.sqrt(var + eps)                              # (COUT,)
    pw_s = w_pw.astype(jnp.float32) * scale[:, None]                 # (COUT, C)
    dw = w_dw.reshape(C, KH * KW).astype(jnp.float32)                # (C, T)
    # W2[cout, tap*C + c] = pw_s[cout, c] * dw[c, tap]   (f32 product, one cast)
    w2 = pw_s[:, None, :] * jnp.transpose(dw)[None, :, :]            # (COUT, T, C)
    w2 = w2.reshape(COUT, KH * KW * C).astype(jnp.bfloat16)
    bias = (beta - mean * scale).astype(jnp.float32).reshape(COUT, 1)
    return w2, bias


# ---------------------------------------------------------------------------
# Pallas kernel: single DartsDwsConv = ReLU -> dilated dw -> 1x1 pw -> BN
# (depthwise folded into the pointwise matmul via im2col)
# ---------------------------------------------------------------------------
def _dws_conv_kernel(x_ref, w2_ref, bias_ref, o_ref, col_ref, *,
                     NB, C, KH, KW, DIL, Wp, Pp):
    # x_ref   : (NB, C, L)        f32   padded images, spatially flattened (row stride Wp)
    # w2_ref  : (COUT, KH*KW*C)   bf16  merged dw*pw*BN-scale weights
    # bias_ref: (COUT, 1)         f32   folded BN bias
    # o_ref   : (NB, COUT, Pp)          lane-dense output slab, Pp % 128 == 0
    # col_ref : (KH*KW*C, NB*Pp)  bf16  im2col scratch
    for nb in range(NB):                           # static, NB is small
        for kh in range(KH):
            for kw in range(KW):
                tap = kh * KW + kw
                off = kh * DIL * Wp + kw * DIL     # pure lane shift (stride 1)
                sl = x_ref[nb, :, off:off + Pp]                      # (C, Pp) ref-backed load
                sl = jnp.maximum(sl, 0.0).astype(jnp.bfloat16)       # ReLU + MXU dtype
                col_ref[tap * C:(tap + 1) * C, nb * Pp:(nb + 1) * Pp] = sl
    out = jnp.dot(w2_ref[...], col_ref[...],
                  preferred_element_type=jnp.float32)                # (COUT, NB*Pp)
    out = out + bias_ref[...]                                        # folded BN bias
    for nb in range(NB):
        o_ref[nb] = out[:, nb * Pp:(nb + 1) * Pp].astype(o_ref.dtype)


def darts_dws_conv(x, w_dw, w_pw, bn_gamma, bn_beta, bn_mean, bn_var,
                   *, stride, padding, dilation, eps=1e-5, images_per_block=1):
    """x: (N, C, H, W) f32; w_dw: (C, KH, KW); w_pw: (COUT, C).  Inference BN."""
    if stride != 1:
        # TODO(synk): stride>1 needs a space-to-depth split so lane slices stay stride-1.
        raise NotImplementedError("only stride=1 DartsDwsConv is implemented")
    N, C, H, W = x.shape
    COUT = w_pw.shape[0]
    KH, KW = int(w_dw.shape[1]), int(w_dw.shape[2])
    HO = (H + 2 * padding - dilation * (KH - 1) - 1) // stride + 1
    WO = (W + 2 * padding - dilation * (KW - 1) - 1) // stride + 1
    Hp, Wp = H + 2 * padding, W + 2 * padding
    P = HO * Wp                                    # valid lane-dense output width
    Pp = _round_up(P, 128)                         # padded to 128 lanes (dense stores)
    # flat input long enough that every tap slice of width Pp is in bounds
    L = _round_up((KH - 1) * dilation * Wp + (KW - 1) * dilation + Pp, 128)

    NB = images_per_block
    assert N % NB == 0, (N, NB)

    # zero-padding commutes with ReLU (relu(0)=0) -> pad + flatten in the wrapper
    x_pad = jnp.pad(x, ((0, 0), (0, 0), (padding, padding), (padding, padding)))
    x_flat = jnp.pad(x_pad.reshape(N, C, Hp * Wp),
                     ((0, 0), (0, 0), (0, L - Hp * Wp)))

    w2, bias = _fold_weights(w_dw, w_pw, bn_gamma, bn_beta, bn_mean, bn_var, eps)

    kernel = functools.partial(_dws_conv_kernel, NB=NB, C=C, KH=KH, KW=KW,
                               DIL=dilation, Wp=Wp, Pp=Pp)
    T = KH * KW
    out_flat = pl.pallas_call(
        kernel,
        out_shape=jax.ShapeDtypeStruct((N, COUT, Pp), x.dtype),
        grid_spec=pltpu.PrefetchScalarGridSpec(
            num_scalar_prefetch=0,
            grid=(N // NB,),
            in_specs=[
                pl.BlockSpec((NB, C, L), lambda n: (n, 0, 0)),
                pl.BlockSpec((COUT, T * C), lambda n: (0, 0)),
                pl.BlockSpec((COUT, 1), lambda n: (0, 0)),
            ],
            out_specs=pl.BlockSpec((NB, COUT, Pp), lambda n: (n, 0, 0)),
            scratch_shapes=[pltpu.VMEM((T * C, NB * Pp), jnp.bfloat16)],
        ),
        compiler_params=pltpu.CompilerParams(
            dimension_semantics=("parallel",)),
    )(x_flat, w2, bias)

    # strip the 128-padding and the Wp->WO padded columns
    return out_flat[:, :, :P].reshape(N, COUT, HO, Wp)[:, :, :, :WO]


# ---------------------------------------------------------------------------
# Pallas kernel: fused sep_conv_3x3 = two back-to-back DartsDwsConv (k=3, s=1,
# pad=1, dil=1); the intermediate activation never leaves VMEM.
# ---------------------------------------------------------------------------
def _sep_conv_kernel(x_ref, w2a_ref, ba_ref, w2b_ref, bb_ref, o_ref,
                     col_ref, mid_ref, *,
                     NB, C, KH, KW, Wp, H, W, Pp, MIDOFF):
    # x_ref   : (NB, C, L1)       f32   padded images, flat (row stride Wp = W+2)
    # w2a/w2b : (C, KH*KW*C)      bf16  merged weights of conv1 / conv2
    # ba/bb   : (C, 1)            f32   folded BN biases
    # o_ref   : (NB, C, Pp)             lane-dense output slab of conv2
    # col_ref : (KH*KW*C, NB*Pp)  bf16  im2col scratch (reused by both convs)
    # mid_ref : (NB, C, L2)       f32   conv1 output in conv2's zero-padded flat layout
    HWp = H * Wp
    # ---- conv1: ReLU -> dw3x3 -> pw1x1 -> BN (one im2col matmul) ------------
    for nb in range(NB):
        for kh in range(KH):
            for kw in range(KW):
                tap = kh * KW + kw
                off = kh * Wp + kw
                sl = jnp.maximum(x_ref[nb, :, off:off + Pp], 0.0).astype(jnp.bfloat16)
                col_ref[tap * C:(tap + 1) * C, nb * Pp:(nb + 1) * Pp] = sl
    y1 = jnp.dot(w2a_ref[...], col_ref[...],
                 preferred_element_type=jnp.float32) + ba_ref[...]   # (C, NB*Pp)
    # ---- re-pad conv1 output into conv2's flat padded layout ----------------
    # conv1 output row stride == conv2 padded row stride (= Wp); shifting the
    # slab by Wp+1 lanes and zeroing the wrapped columns yields exactly the
    # zero-padded flat image for conv2.
    mid_ref[...] = jnp.zeros_like(mid_ref)
    lane = lax.broadcasted_iota(jnp.int32, (1, HWp), 1)
    keep = (lane % Wp) < W                                           # mask wrapped cols
    for nb in range(NB):
        seg = y1[:, nb * Pp:nb * Pp + HWp]
        mid_ref[nb, :, MIDOFF + Wp + 1: MIDOFF + Wp + 1 + HWp] = jnp.where(keep, seg, 0.0)
    # ---- conv2: ReLU -> dw3x3 -> pw1x1 -> BN --------------------------------
    for nb in range(NB):
        for kh in range(KH):
            for kw in range(KW):
                tap = kh * KW + kw
                off = MIDOFF + kh * Wp + kw
                sl = jnp.maximum(mid_ref[nb, :, off:off + Pp], 0.0).astype(jnp.bfloat16)
                col_ref[tap * C:(tap + 1) * C, nb * Pp:(nb + 1) * Pp] = sl
    y2 = jnp.dot(w2b_ref[...], col_ref[...],
                 preferred_element_type=jnp.float32) + bb_ref[...]
    for nb in range(NB):
        o_ref[nb] = y2[:, nb * Pp:(nb + 1) * Pp].astype(o_ref.dtype)


def darts_sep_conv(x, p1, p2, *, eps=1e-5, images_per_block=1):
    """Fused sep_conv_3x3 (stride 1): DartsDwsConv(k3,p1,d1) o DartsDwsConv(k3,p1,d1)."""
    N, C, H, W = x.shape
    KH = KW = 3
    Hp, Wp = H + 2, W + 2
    HO, WO = H, W                                  # 3x3, pad 1 preserves the size
    P = HO * Wp
    Pp = _round_up(P, 128)
    L1 = _round_up((KH - 1) * Wp + (KW - 1) + Pp, 128)
    MIDOFF = (-(Wp + 1)) % 128                     # so the mid-slab copy lands 128-aligned
    L2 = _round_up(MIDOFF + (KH - 1) * Wp + (KW - 1) + Pp, 128)

    NB = images_per_block
    assert N % NB == 0, (N, NB)

    x_pad = jnp.pad(x, ((0, 0), (0, 0), (1, 1), (1, 1)))
    x_flat = jnp.pad(x_pad.reshape(N, C, Hp * Wp),
                     ((0, 0), (0, 0), (0, L1 - Hp * Wp)))

    w2a, ba = _fold_weights(p1["w_dw"], p1["w_pw"], p1["gamma"], p1["beta"],
                            p1["mean"], p1["var"], eps)
    w2b, bb = _fold_weights(p2["w_dw"], p2["w_pw"], p2["gamma"], p2["beta"],
                            p2["mean"], p2["var"], eps)

    kernel = functools.partial(_sep_conv_kernel, NB=NB, C=C, KH=KH, KW=KW,
                               Wp=Wp, H=H, W=W, Pp=Pp, MIDOFF=MIDOFF)
    T = KH * KW
    out_flat = pl.pallas_call(
        kernel,
        out_shape=jax.ShapeDtypeStruct((N, C, Pp), x.dtype),
        grid_spec=pltpu.PrefetchScalarGridSpec(
            num_scalar_prefetch=0,
            grid=(N // NB,),
            in_specs=[
                pl.BlockSpec((NB, C, L1), lambda n: (n, 0, 0)),
                pl.BlockSpec((C, T * C), lambda n: (0, 0)),
                pl.BlockSpec((C, 1), lambda n: (0, 0)),
                pl.BlockSpec((C, T * C), lambda n: (0, 0)),
                pl.BlockSpec((C, 1), lambda n: (0, 0)),
            ],
            out_specs=pl.BlockSpec((NB, C, Pp), lambda n: (n, 0, 0)),
            scratch_shapes=[
                pltpu.VMEM((T * C, NB * Pp), jnp.bfloat16),   # im2col (reused)
                pltpu.VMEM((NB, C, L2), jnp.float32),         # intermediate activation
            ],
        ),
        compiler_params=pltpu.CompilerParams(
            dimension_semantics=("parallel",)),
    )(x_flat, w2a, ba, w2b, bb)

    return out_flat[:, :, :P].reshape(N, C, HO, Wp)[:, :, :, :WO]


# ---------------------------------------------------------------------------
# pure-lax reference for one DartsDwsConv (verification only)
# ---------------------------------------------------------------------------
def _dws_conv_reference(x, w_dw, w_pw, bn_gamma, bn_beta, bn_mean, bn_var,
                        *, stride, padding, dilation, eps=1e-5):
    C = x.shape[1]
    r = jnp.maximum(x, 0.0)
    dw = lax.conv_general_dilated(
        r, w_dw[:, None, :, :], window_strides=(stride, stride),
        padding=((padding, padding), (padding, padding)),
        rhs_dilation=(dilation, dilation), feature_group_count=C,
        dimension_numbers=("NCHW", "OIHW", "NCHW"))
    pw = lax.conv_general_dilated(
        dw, w_pw[:, :, None, None], window_strides=(1, 1), padding="VALID",
        dimension_numbers=("NCHW", "OIHW", "NCHW"))
    scale = bn_gamma / jnp.sqrt(bn_var + eps)
    bias = bn_beta - bn_mean * scale
    return pw * scale[None, :, None, None] + bias[None, :, None, None]


# ---------------------------------------------------------------------------
# DartsMainBlock wiring (genotype ops; DWS convs use the Pallas kernels)
# ---------------------------------------------------------------------------
def _maxpool3x3(x, stride):
    # TODO(synk): max-pool is plain lax.reduce_window here, not a Pallas kernel.
    return lax.reduce_window(
        x, -jnp.inf, lax.max,
        window_dimensions=(1, 1, 3, 3),
        window_strides=(1, 1, stride, stride),
        padding=((0, 0), (0, 0), (1, 1), (1, 1)))


def _apply_op(name, params, x, stride, use_pallas):
    if name == "max_pool_3x3":
        return _maxpool3x3(x, stride)
    if name == "skip_connect":
        assert stride == 1  # TODO(synk): stride-2 skip (DartsReduceBranch) not implemented.
        return x
    if name == "dil_conv_3x3":
        p = params
        fn = darts_dws_conv if use_pallas else _dws_conv_reference
        return fn(x, p["w_dw"], p["w_pw"], p["gamma"], p["beta"], p["mean"],
                  p["var"], stride=stride, padding=2, dilation=2)
    if name == "sep_conv_3x3":
        p1, p2 = params
        if use_pallas:
            if stride != 1:
                raise NotImplementedError("stride>1 sep_conv_3x3 not implemented")
            return darts_sep_conv(x, p1, p2)
        y = _dws_conv_reference(x, p1["w_dw"], p1["w_pw"], p1["gamma"], p1["beta"],
                                p1["mean"], p1["var"], stride=stride, padding=1, dilation=1)
        return _dws_conv_reference(y, p2["w_dw"], p2["w_pw"], p2["gamma"], p2["beta"],
                                   p2["mean"], p2["var"], stride=1, padding=1, dilation=1)
    raise ValueError(f"unknown genotype op: {name}")


def darts_main_block(genotype, params_list, x, x_prev, *, use_pallas=True, reduction=False):
    op_names, indices = zip(*genotype)
    steps = len(op_names) // 2
    states = [x_prev, x]
    for i in range(steps):
        j1, j2 = 2 * i, 2 * i + 1
        s1 = 2 if (reduction and indices[j1] < 2) else 1
        s2 = 2 if (reduction and indices[j2] < 2) else 1
        y1 = _apply_op(op_names[j1], params_list[j1], states[indices[j1]], s1, use_pallas)
        y2 = _apply_op(op_names[j2], params_list[j2], states[indices[j2]], s2, use_pallas)
        states.append(y1 + y2)
    return jnp.concatenate([states[i] for i in (2, 3, 4, 5)], axis=1)


def _init_dws_params(key, c_in, c_out, k=3):
    k1, k2, k3, k4 = jax.random.split(key, 4)
    return dict(
        w_dw=jax.random.normal(k1, (c_in, k, k), jnp.float32) * 0.2,
        w_pw=jax.random.normal(k2, (c_out, c_in), jnp.float32) * 0.2,
        gamma=jax.random.uniform(k3, (c_out,), jnp.float32, minval=0.8, maxval=1.2),
        beta=jax.random.normal(k4, (c_out,), jnp.float32) * 0.1,
        mean=jnp.zeros((c_out,), jnp.float32),   # fresh running stats, inference BN
        var=jnp.ones((c_out,), jnp.float32))


if __name__ == "__main__":
    N, C, H, W = 2, 4, 16, 16
    key = jax.random.PRNGKey(0)
    kx, kp, *op_keys = jax.random.split(key, 10)
    x = jax.random.normal(kx, (N, C, H, W), dtype=jnp.float32)
    x_prev = jax.random.normal(kp, (N, C, H, W), dtype=jnp.float32)

    # normal (non-reduction) DARTS cell exercising all four genotype ops
    genotype = [("dil_conv_3x3", 0), ("sep_conv_3x3", 1),
                ("max_pool_3x3", 0), ("skip_connect", 1),
                ("dil_conv_3x3", 2), ("skip_connect", 3),
                ("sep_conv_3x3", 2), ("max_pool_3x3", 4)]

    params_list = []
    for (name, _), k in zip(genotype, op_keys):
        if name == "dil_conv_3x3":
            params_list.append(_init_dws_params(k, C, C))
        elif name == "sep_conv_3x3":
            ka, kb = jax.random.split(k)
            params_list.append((_init_dws_params(ka, C, C), _init_dws_params(kb, C, C)))
        else:
            params_list.append(None)

    # 1) direct check of the im2col DWS-conv kernel (dil_conv_3x3 config)
    p0 = params_list[0]
    out_k = darts_dws_conv(x, p0["w_dw"], p0["w_pw"], p0["gamma"], p0["beta"],
                           p0["mean"], p0["var"], stride=1, padding=2, dilation=2)
    out_k = jax.block_until_ready(out_k)
    out_r = _dws_conv_reference(x, p0["w_dw"], p0["w_pw"], p0["gamma"], p0["beta"],
                                p0["mean"], p0["var"], stride=1, padding=2, dilation=2)
    assert out_k.shape == out_r.shape, (out_k.shape, out_r.shape)
    assert jnp.allclose(out_k, out_r, rtol=5e-2, atol=5e-2), \
        float(jnp.max(jnp.abs(out_k - out_r)))

    # 2) direct check of the fused sep_conv_3x3 kernel
    p1, p2 = params_list[1]
    out_s = jax.block_until_ready(darts_sep_conv(x, p1, p2))
    mid_r = _dws_conv_reference(x, p1["w_dw"], p1["w_pw"], p1["gamma"], p1["beta"],
                                p1["mean"], p1["var"], stride=1, padding=1, dilation=1)
    out_sr = _dws_conv_reference(mid_r, p2["w_dw"], p2["w_pw"], p2["gamma"], p2["beta"],
                                 p2["mean"], p2["var"], stride=1, padding=1, dilation=1)
    assert out_s.shape == out_sr.shape, (out_s.shape, out_sr.shape)
    assert jnp.allclose(out_s, out_sr, rtol=5e-2, atol=5e-2), \
        float(jnp.max(jnp.abs(out_s - out_sr)))

    # 3) full DartsMainBlock forward: Pallas kernels vs. pure-lax composition
    out_block = darts_main_block(genotype, params_list, x, x_prev, use_pallas=True)
    out_block = jax.block_until_ready(out_block)
    ref_block = darts_main_block(genotype, params_list, x, x_prev, use_pallas=False)
    assert out_block.shape == (N, 4 * C, H, W), out_block.shape
    assert jnp.allclose(out_block, ref_block, rtol=5e-2, atol=5e-2), \
        float(jnp.max(jnp.abs(out_block - ref_block)))

    print("KERNEL_OK")
</pallas_src>

<mosaic_0001>
module attributes {stable_mosaic.version = 11 : i64} {
  func.func @_dws_conv_kernel(%arg0: i32, %arg1: memref<1x4x512xf32, #tpu.memory_space<vmem>>, %arg2: memref<4x36xbf16, #tpu.memory_space<vmem>>, %arg3: memref<4x1xf32, #tpu.memory_space<vmem>>, %arg4: memref<1x4x384xf32, #tpu.memory_space<vmem>>, %arg5: memref<36x384xbf16, #tpu.memory_space<vmem>>) attributes {dimension_semantics = [#tpu.dimension_semantics<parallel>], iteration_bounds = array<i64: 2>, scalar_prefetch = 0 : i64, scratch_operands = 1 : i64, tpu.core_type = #tpu.core_type<tc>, window_params = [{transform_indices = @transform_0, window_bounds = array<i64: 1, 4, 512>}, {pipeline_mode = #tpu.pipeline_mode<synchronous>, transform_indices = @transform_1, window_bounds = array<i64: 4, 36>}, {pipeline_mode = #tpu.pipeline_mode<synchronous>, transform_indices = @transform_2, window_bounds = array<i64: 4, 1>}, {transform_indices = @transform_3, window_bounds = array<i64: 1, 4, 384>}]} {
    %c0 = arith.constant 0 : index
    %c0_0 = arith.constant 0 : index
    %c0_1 = arith.constant 0 : index
    %0 = vector.load %arg1[%c0, %c0_0, %c0_1] : memref<1x4x512xf32, #tpu.memory_space<vmem>>, vector<1x4x384xf32>
    %1 = vector.shape_cast %0 : vector<1x4x384xf32> to vector<4x384xf32>
    %cst = arith.constant 0.000000e+00 : f32
    %2 = vector.broadcast %cst : f32 to vector<4x384xf32>
    %3 = arith.maximumf %1, %2 : vector<4x384xf32>
    %4 = arith.truncf %3 : vector<4x384xf32> to vector<4x384xbf16>
    %c0_2 = arith.constant 0 : index
    %c0_3 = arith.constant 0 : index
    %5 = vector.load %arg5[%c0_2, %c0_3] : memref<36x384xbf16, #tpu.memory_space<vmem>>, vector<4x384xbf16>
    tpu.vector_store %arg5[%c0_2, %c0_3], %4 {strides = array<i32>} : memref<36x384xbf16, #tpu.memory_space<vmem>>, vector<4x384xbf16>,
    %c0_4 = arith.constant 0 : index
    %c0_5 = arith.constant 0 : index
    %c2 = arith.constant 2 : index
    %6 = vector.load %arg1[%c0_4, %c0_5, %c2] : memref<1x4x512xf32, #tpu.memory_space<vmem>>, vector<1x4x384xf32>
    %7 = vector.shape_cast %6 : vector<1x4x384xf32> to vector<4x384xf32>
    %cst_6 = arith.constant 0.000000e+00 : f32
    %8 = vector.broadcast %cst_6 : f32 to vector<4x384xf32>
    %9 = arith.maximumf %7, %8 : vector<4x384xf32>
    %10 = arith.truncf %9 : vector<4x384xf32> to vector<4x384xbf16>
    %c4 = arith.constant 4 : index
    %c0_7 = arith.constant 0 : index
    %11 = vector.load %arg5[%c4, %c0_7] : memref<36x384xbf16, #tpu.memory_space<vmem>>, vector<4x384xbf16>
    tpu.vector_store %arg5[%c4, %c0_7], %10 {strides = array<i32>} : memref<36x384xbf16, #tpu.memory_space<vmem>>, vector<4x384xbf16>,
    %c0_8 = arith.constant 0 : index
    %c0_9 = arith.constant 0 : index
    %c4_10 = arith.constant 4 : index
    %12 = vector.load %arg1[%c0_8, %c0_9, %c4_10] : memref<1x4x512xf32, #tpu.memory_space<vmem>>, vector<1x4x384xf32>
    %13 = vector.shape_cast %12 : vector<1x4x384xf32> to vector<4x384xf32>
    %cst_11 = arith.constant 0.000000e+00 : f32
    %14 = vector.broadcast %cst_11 : f32 to vector<4x384xf32>
    %15 = arith.maximumf %13, %14 : vector<4x384xf32>
    %16 = arith.truncf %15 : vector<4x384xf32> to vector<4x384xbf16>
    %c8 = arith.constant 8 : index
    %c0_12 = arith.constant 0 : index
    %17 = vector.load %arg5[%c8, %c0_12] : memref<36x384xbf16, #tpu.memory_space<vmem>>, vector<4x384xbf16>
    tpu.vector_store %arg5[%c8, %c0_12], %16 {strides = array<i32>} : memref<36x384xbf16, #tpu.memory_space<vmem>>, vector<4x384xbf16>,
    %c0_13 = arith.constant 0 : index
    %c0_14 = arith.constant 0 : index
    %c40 = arith.constant 40 : index
    %18 = vector.load %arg1[%c0_13, %c0_14, %c40] : memref<1x4x512xf32, #tpu.memory_space<vmem>>, vector<1x4x384xf32>
    %19 = vector.shape_cast %18 : vector<1x4x384xf32> to vector<4x384xf32>
    %cst_15 = arith.constant 0.000000e+00 : f32
    %20 = vector.broadcast %cst_15 : f32 to vector<4x384xf32>
    %21 = arith.maximumf %19, %20 : vector<4x384xf32>
    %22 = arith.truncf %21 : vector<4x384xf32> to vector<4x384xbf16>
    %c12 = arith.constant 12 : index
    %c0_16 = arith.constant 0 : index
    %23 = vector.load %arg5[%c12, %c0_16] : memref<36x384xbf16, #tpu.memory_space<vmem>>, vector<4x384xbf16>
    tpu.vector_store %arg5[%c12, %c0_16], %22 {strides = array<i32>} : memref<36x384xbf16, #tpu.memory_space<vmem>>, vector<4x384xbf16>,
    %c0_17 = arith.constant 0 : index
    %c0_18 = arith.constant 0 : index
    %c42 = arith.constant 42 : index
    %24 = vector.load %arg1[%c0_17, %c0_18, %c42] : memref<1x4x512xf32, #tpu.memory_space<vmem>>, vector<1x4x384xf32>
    %25 = vector.shape_cast %24 : vector<1x4x384xf32> to vector<4x384xf32>
    %cst_19 = arith.constant 0.000000e+00 : f32
    %26 = vector.broadcast %cst_19 : f32 to vector<4x384xf32>
    %27 = arith.maximumf %25, %26 : vector<4x384xf32>
    %28 = arith.truncf %27 : vector<4x384xf32> to vector<4x384xbf16>
    %c16 = arith.constant 16 : index
    %c0_20 = arith.constant 0 : index
    %29 = vector.load %arg5[%c16, %c0_20] : memref<36x384xbf16, #tpu.memory_space<vmem>>, vector<4x384xbf16>
    tpu.vector_store %arg5[%c16, %c0_20], %28 {strides = array<i32>} : memref<36x384xbf16, #tpu.memory_space<vmem>>, vector<4x384xbf16>,
    %c0_21 = arith.constant 0 : index
    %c0_22 = arith.constant 0 : index
    %c44 = arith.constant 44 : index
    %30 = vector.load %arg1[%c0_21, %c0_22, %c44] : memref<1x4x512xf32, #tpu.memory_space<vmem>>, vector<1x4x384xf32>
    %31 = vector.shape_cast %30 : vector<1x4x384xf32> to vector<4x384xf32>
    %cst_23 = arith.constant 0.000000e+00 : f32
    %32 = vector.broadcast %cst_23 : f32 to vector<4x384xf32>
    %33 = arith.maximumf %31, %32 : vector<4x384xf32>
    %34 = arith.truncf %33 : vector<4x384xf32> to vector<4x384xbf16>
    %c20 = arith.constant 20 : index
    %c0_24 = arith.constant 0 : index
    %35 = vector.load %arg5[%c20, %c0_24] : memref<36x384xbf16, #tpu.memory_space<vmem>>, vector<4x384xbf16>
    tpu.vector_store %arg5[%c20, %c0_24], %34 {strides = array<i32>} : memref<36x384xbf16, #tpu.memory_space<vmem>>, vector<4x384xbf16>,
    %c0_25 = arith.constant 0 : index
    %c0_26 = arith.constant 0 : index
    %c80 = arith.constant 80 : index
    %36 = vector.load %arg1[%c0_25, %c0_26, %c80] : memref<1x4x512xf32, #tpu.memory_space<vmem>>, vector<1x4x384xf32>
    %37 = vector.shape_cast %36 : vector<1x4x384xf32> to vector<4x384xf32>
    %cst_27 = arith.constant 0.000000e+00 : f32
    %38 = vector.broadcast %cst_27 : f32 to vector<4x384xf32>
    %39 = arith.maximumf %37, %38 : vector<4x384xf32>
    %40 = arith.truncf %39 : vector<4x384xf32> to vector<4x384xbf16>
    %c24 = arith.constant 24 : index
    %c0_28 = arith.constant 0 : index
    %41 = vector.load %arg5[%c24, %c0_28] : memref<36x384xbf16, #tpu.memory_space<vmem>>, vector<4x384xbf16>
    tpu.vector_store %arg5[%c24, %c0_28], %40 {strides = array<i32>} : memref<36x384xbf16, #tpu.memory_space<vmem>>, vector<4x384xbf16>,
    %c0_29 = arith.constant 0 : index
    %c0_30 = arith.constant 0 : index
    %c82 = arith.constant 82 : index
    %42 = vector.load %arg1[%c0_29, %c0_30, %c82] : memref<1x4x512xf32, #tpu.memory_space<vmem>>, vector<1x4x384xf32>
    %43 = vector.shape_cast %42 : vector<1x4x384xf32> to vector<4x384xf32>
    %cst_31 = arith.constant 0.000000e+00 : f32
    %44 = vector.broadcast %cst_31 : f32 to vector<4x384xf32>
    %45 = arith.maximumf %43, %44 : vector<4x384xf32>
    %46 = arith.truncf %45 : vector<4x384xf32> to vector<4x384xbf16>
    %c28 = arith.constant 28 : index
    %c0_32 = arith.constant 0 : index
    %47 = vector.load %arg5[%c28, %c0_32] : memref<36x384xbf16, #tpu.memory_space<vmem>>, vector<4x384xbf16>
    tpu.vector_store %arg5[%c28, %c0_32], %46 {strides = array<i32>} : memref<36x384xbf16, #tpu.memory_space<vmem>>, vector<4x384xbf16>,
    %c0_33 = arith.constant 0 : index
    %c0_34 = arith.constant 0 : index
    %c84 = arith.constant 84 : index
    %48 = vector.load %arg1[%c0_33, %c0_34, %c84] : memref<1x4x512xf32, #tpu.memory_space<vmem>>, vector<1x4x384xf32>
    %49 = vector.shape_cast %48 : vector<1x4x384xf32> to vector<4x384xf32>
    %cst_35 = arith.constant 0.000000e+00 : f32
    %50 = vector.broadcast %cst_35 : f32 to vector<4x384xf32>
    %51 = arith.maximumf %49, %50 : vector<4x384xf32>
    %52 = arith.truncf %51 : vector<4x384xf32> to vector<4x384xbf16>
    %c32 = arith.constant 32 : index
    %c0_36 = arith.constant 0 : index
    %53 = vector.load %arg5[%c32, %c0_36] : memref<36x384xbf16, #tpu.memory_space<vmem>>, vector<4x384xbf16>
    tpu.vector_store %arg5[%c32, %c0_36], %52 {strides = array<i32>} : memref<36x384xbf16, #tpu.memory_space<vmem>>, vector<4x384xbf16>,
    %c0_37 = arith.constant 0 : index
    %c0_38 = arith.constant 0 : index
    %54 = vector.load %arg2[%c0_37, %c0_38] : memref<4x36xbf16, #tpu.memory_space<vmem>>, vector<4x36xbf16>
    %c0_39 = arith.constant 0 : index
    %c0_40 = arith.constant 0 : index
    %55 = vector.load %arg5[%c0_39, %c0_40] : memref<36x384xbf16, #tpu.memory_space<vmem>>, vector<36x384xbf16>
    %cst_41 = arith.constant dense<0.000000e+00> : vector<4x384xf32>
    %56 = tpu.matmul %54, %55, %cst_41 {dimension_numbers = #tpu.dot_dimension_numbers<[1], [0], [0], [1], [0, 0, 1, 1], [], []>} : vector<4x36xbf16>, vector<36x384xbf16>, vector<4x384xf32> -> vector<4x384xf32>
    %c0_42 = arith.constant 0 : index
    %c0_43 = arith.constant 0 : index
    %57 = vector.load %arg3[%c0_42, %c0_43] : memref<4x1xf32, #tpu.memory_space<vmem>>, vector<4x1xf32>
    %58 = vector.broadcast %57 : vector<4x1xf32> to vector<4x384xf32>
    %59 = arith.addf %56, %58 : vector<4x384xf32>
    %c0_44 = arith.constant 0 : index
    %c0_45 = arith.constant 0 : index
    %c0_46 = arith.constant 0 : index
    %60 = vector.load %arg4[%c0_44, %c0_45, %c0_46] : memref<1x4x384xf32, #tpu.memory_space<vmem>>, vector<1x4x384xf32>
    %61 = vector.shape_cast %60 : vector<1x4x384xf32> to vector<4x384xf32>
    %62 = vector.shape_cast %59 : vector<4x384xf32> to vector<1x4x384xf32>
    tpu.vector_store %arg4[%c0_44, %c0_45, %c0_46], %62 {strides = array<i32>} : memref<1x4x384xf32, #tpu.memory_space<vmem>>, vector<1x4x384xf32>,
    return
  }
  func.func @transform_0(%arg0: i32) -> (i32, i32, i32) {
    %c0_i32 = arith.constant 0 : i32
    %c0_i32_0 = arith.constant 0 : i32
    %c0_i32_1 = arith.constant 0 : i32
    return %arg0, %c0_i32, %c0_i32_0 : i32, i32, i32
  }
  func.func @transform_1(%arg0: i32) -> (i32, i32) {
    %c0_i32 = arith.constant 0 : i32
    %c0_i32_0 = arith.constant 0 : i32
    %c0_i32_1 = arith.constant 0 : i32
    return %c0_i32, %c0_i32_0 : i32, i32
  }
  func.func @transform_2(%arg0: i32) -> (i32, i32) {
    %c0_i32 = arith.constant 0 : i32
    %c0_i32_0 = arith.constant 0 : i32
    %c0_i32_1 = arith.constant 0 : i32
    return %c0_i32, %c0_i32_0 : i32, i32
  }
  func.func @transform_3(%arg0: i32) -> (i32, i32, i32) {
    %c0_i32 = arith.constant 0 : i32
    %c0_i32_0 = arith.constant 0 : i32
    %c0_i32_1 = arith.constant 0 : i32
    return %arg0, %c0_i32, %c0_i32_0 : i32, i32, i32
  }
}

</mosaic_0001>

<bundles_post_ra>
// kernel: tpu_custom_call.1
= control target key start
LH: loop header
LB: loop body
LE: loop exit
PB: predicated region body
PF: predicated region fallthrough
CT: control target
= control target key end

     0   :  { %8 = vsyncpa [#allocation4], 0  ;;  %s1207_s0 = inlined_call_operand.hbm [shape: f32[2,4,512], index: 0, kind: input, shape index: {}]   ;;  %s1208_s1 = inlined_call_operand.vmem [shape: bf16[4,36], index: 1, kind: input, shape index: {}]   ;;  %s1209_s2 = inlined_call_operand.vmem [shape: f32[4,1], index: 2, kind: input, shape index: {}]   ;;  %s1210_s3 = inlined_call_operand.hbm [shape: f32[2,4,384], index: 3, kind: output, shape index: {}]  }
   0x1   :  { %10 = vsyncpa [#allocation4 + $0x1], 0 }
   0x2   :  { %11 = vsyncpa [#allocation5], 0 }
   0x3   :  { %13 = vsyncpa [#allocation5 + $0x1], 0  ;;  %s1038_s12 = smov 0   ;;  %s1040_s13 = smov 0  }
   0x4   :  { %s1042_s14 = smov 0   ;;  %s1044_s15 = smov 0  }
   0x5 LB: > { %s1059_s16 = sadd.s32 4294967295, %s1003_s15   ;;  %s766_s17 = sadd.s32 4294967294, %s1003_s15   ;;  %s1003_s15 = sphi %s1044_s15, %s1227_s15   ;;  %s999_s14 = sphi %s1042_s14, %s1226_s14   ;;  %s995_s13 = sphi %s1040_s13, %s1225_s13   ;;  %s991_s12 = sphi %s1038_s12, %s1224_s12  }
   0x6   : > { %s1063_s18 = sadd.s32 1, %s1003_s15   ;;  %s26_s19 = sadd.s32 1, %s999_s14 }
   0x7   : > { %s23_s20 = ssub.s32 %s1003_s15, %s1063_s18  ;;  %p33_p0 = scmp.ne.s32.totalorder %s999_s14, %s995_s13 }
   0x8   : > { %p24_p1 = scmp.eq.s32.totalorder %s23_s20, 0  ;;  %p34_p2 = scmp.eq.s32.totalorder %s1003_s15, 0 }
   0x9   : > { %p39_p3 = scmp.ne.s32.totalorder %s995_s13, %s991_s12  ;;  %p40_p4 = scmp.eq.s32.totalorder %s1059_s16, 0 }
   0xa   : > { %s1075_s21 = scalar_select %p24_p1, %s999_s14, %s26_s19  }
   0xb   : > { %p1077_p5 = por %p34_p2, %p33_p0  ;;  %p1081_p6 = por %p40_p4, %p39_p3 }
   0xc   : > { %p105_p7 = scmp.eq.s32.totalorder %s1059_s16, 1  ;;  %p111_p8 = scmp.eq.s32.totalorder %s766_s17, 1 }
   0xd   : > { %s1214_s23 = scalar_select %p1081_p6, 1, 0 }
   0xe   : > { %p854_p10 = scmp.lt.s32.totalorder %s1003_s15, 2  ;;  %p1088_p11 = por %p105_p7, %p33_p0 }
   0xf   : > { %p1092_p12 = por %p111_p8, %p39_p3  ;;  %s137_s26 = sand.u32 1, %s999_s14  }
  0x10   : > { %s1215_s24 = scalar_select %p1088_p11, 1, 0 }
  0x11   : > { %s1216_s25 = scalar_select %p1092_p12, 1, 0 }
  0x12   : > { %s807_s27 = sshll.u32 %s1003_s15, 8  ;;  %s769_s28 = sshll.u32 %s137_s26, 4 }
  0x13   : > { %s1101_s4 = scalar_lea.hbm %s1207_s0, %s807_s27  ;;  %s141_s5 = scalar_lea.vmem [#allocation3], %s769_s28 }
  0x14   : > { %s149_s6 = sshll.u32 %s141_s5, 4  ;;  %p1105_p13 = pnand %p854_p10, %p1077_p5  ;;  %s1109_s6 = int_to_ptr.vmem [resolvable:$true] %s149_s6 }
  0x15   : > { %s138_s8 = scalar_lea.sflag [#allocation4], %s137_s26  ;;  %s911_s9 = scalar_lea.hbm %s1101_s4, 256 }
  0x16   : > { %p912_p2 = scmp.ne.s32.totalorder %s1101_s4, %s911_s9  ;;  %p913_p3 = pneg %p1105_p13 }
  0x17   : > { %s916_s17 = scalar_lea.hbm %s1207_s0, 512  ;;  %p917_p5 = scmp.lt.s32.totalorder %s1101_s4, %s1207_s0 }
  0x18   : > { %p914_p4 = pnand %p913_p3, %p912_p2  ;;  %p918_p8 = scmp.lt.s32.totalorder %s916_s17, %s911_s9 }
  0x1a   : > { %p915_p7 = pneg %p914_p4  ;;  %p919_p10 = por %p918_p8, %p917_p5 }
  0x1c   : > { %p920_p9 = pnand %p919_p10, %p915_p7 }
  0x1e   : > { %923 = shalt.err (!%p920_p9)
}
  0x1f   : > { %s924_s22 = scalar_lea.vmem %s1109_s6, 256  ;;  %s1005_s26 = smov [#allocation3]  }
  0x20   : > { %p925_p0 = scmp.ne.s32.totalorder %s1109_s6, %s924_s22  ;;  %s929_s27 = sshll.u32 %s1005_s26, 4  ;;  %s930_s27 = int_to_ptr.vmem [resolvable:$false] %s929_s27 }
  0x21   : > { %s931_s28 = scalar_lea.vmem %s930_s27, 512  ;;  %p932_p4 = scmp.lt.s32.totalorder %s1109_s6, %s930_s27 }
  0x22   : > { %p927_p1 = pnand %p925_p0, %p913_p3  ;;  %p933_p12 = scmp.lt.s32.totalorder %s931_s28, %s924_s22 }
  0x24   : > { %p928_p2 = pneg %p927_p1  ;;  %p934_p11 = por %p933_p12, %p932_p4 }
  0x26   : > { %p935_p6 = pnand %p934_p11, %p928_p2 }
  0x28   : > { %938 = shalt.err (!%p935_p6)
}
  0x29   : > { %849 = dma.hbm_to_vmem [thread:$0]  (!%p1105_p13), %s1101_s4, 256, %s1109_s6, %s138_s8  }
  0x2a   : > { %p1218_p9 = scmp.lt.s32.totalorder %s1003_s15, 3  ;;  %p1219_p7 = scmp.ge.s32.totalorder %s1003_s15, 1 }
  0x2c   : > { %p155_p0 = pnand %p1219_p7, %p1218_p9 }
  0x2d   : > { %s1136_s29 = sand.u32 (!%p155_p0), 1, %s995_s13   ;;  %p1220_p6 = scmp.ne.s32.totalorder (!%p155_p0), %s1214_s23, 0 }
  0x2e   : > { %158 = sbr.rel (%p155_p0) target bundleno = 430 (0x1ae), region = 32  ;;  %s773_s30 = sshll.u32 (!%p155_p0), %s1136_s29, 4 }
  0x2f   : > { %s161_s5 = scalar_lea.sflag (!%p155_p0), [#allocation4], %s1136_s29  ;;  %s164_s9 = scalar_lea.vmem (!%p155_p0), [#allocation3], %s773_s30 }
  0x33   : > { %982 = dma.done.wait (%p1220_p6), %s161_s5, 256  }
  0x34   : > { %984 = vsyncadd (%p1220_p6), %s161_s5, 4294967040  ;;  %v485_v0 = vld [vmem:[%s164_s9] sm:$0xff]  ;;  %v486_v1 = vld [vmem:[%s164_s9 + $0x8] sm:$0xff]  ;;  %s1006_s4 = smov 44   ;;  %s1007_s6 = smov 86   ;;  %v1008_v8 = vmov 0.0  }
  0x35   : > { %v487_v2 = vmax.f32 %v485_v0, 0.0  ;;  %v488_v3 = vmax.f32 %v486_v1, 0.0  ;;  %830 = vmatprep.subr.bf16.mxu1 %v1008_v8  ;;  %v189_v9 = vld [vmem:[%s164_s9 + $0x8] sm:$0xf]  ;;  %s1009_s23 = smov 48   ;;  %s1010_s7 = smov 84  }
  0x36   : > { %v191_v10 = vmax.f32 %v189_v9, 0.0  ;;  %s1011_s8 = smov 46   ;;  %s1012_s10 = smov 126   ;;  %vm1015_vm0 = vmmov 0   ;;  %v1016_v14 = vmov 0   ;;  %vm242_vm1 = vcmask 1043456  }
  0x37   : > { %v491_v4 = vcombine.high %v487_v2, %v487_v2  ;;  %v492_v5 = vcombine.high %v488_v3, %v488_v3  ;;  %s1013_s11 = smov 124   ;;  %s1014_s17 = smov 88   ;;  %836 = vmatprep.mubr.msk.bf16.mxu1 %vm1015_vm0, %v1008_v8  ;;  %626 = vmatprep.mubr.bf16.mxu0 %v1016_v14  ;;  %v534_v15 = vld [vmem:[%s1209_s2] sm:$0xf]  ;;  %vm516_vm2 = vcmask 359424   ;;  %vm360_vm3 = vcmask 703488  }
  0x38   : > { %v809_v13 = vpack.c.bf16 %v191_v10, %v191_v10  ;;  %899 = vset.pattern.permute.xlu0 %v1016_v14  ;;  %vm438_vm4 = vcmask 392192   ;;  %vm400_vm5 = vcmask 687104   ;;  %vm584_vm6 = vcmask 1041408   ;;  %s840_s27 = smul.u32 12, %s1136_s29  ;;  %p1221_p12 = scmp.ne.s32.totalorder %s1215_s24, 0 }
  0x39   : > { %v824_v6 = vpack.c.bf16 %v491_v4, %v487_v2  ;;  %v825_v7 = vpack.c.bf16 %v492_v5, %v488_v3  ;;  %vm478_vm7 = vcmask 375808   ;;  %vm244_vm8 = vcmask 1031168   ;;  %s841_s30 = smul.u32 192, %s1059_s16  ;;  %s1017_s16 = smov [#allocation6]  }
  0x3a   : > { %209 = vst [vmem:[#allocation2 + $0x8] sm:$0x3] %v809_v13  ;;  %vm282_vm9 = vcmask 1014784   ;;  %vm322_vm10 = vcmask 719872   ;;  %vm580_vm11 = vcmask 293888   ;;  %s186_s28 = scalar_lea.vmem [#allocation6], %s840_s27 }
  0x3b   : > { %509 = vrot.lane.b32.xlu0 %v824_v6, %s1006_s4  ;;  %353 = vrot.lane.b32.xlu1 %v824_v6, %s1007_s6  ;;  %208 = vst [vmem:[#allocation2] sm:$0x33] %v824_v6  ;;  %v391_v11 = vrot.slane %v824_v6, 6  ;;  %v392_v12 = vrot.slane %v825_v7, 6  ;;  %s696_s5 = sshll.u32 %s186_s28, 4  ;;  %s697_s5 = int_to_ptr.vmem [resolvable:$true] %s696_s5 }
  0x3f   : > { %511 = vrot.lane.b32.xlu0 %v825_v7, %s1006_s4  ;;  %355 = vrot.lane.b32.xlu1 %v825_v7, %s1007_s6  ;;  %s1170_s6 = scalar_lea.hbm %s1210_s3, %s841_s30 }
  0x43   : > { %431 = vrot.lane.b32.xlu0 %v824_v6, %s1009_s23  ;;  %433 = vrot.lane.b32.xlu1 %v825_v7, %s1009_s23  ;;  %s682_s23 = scalar_lea.sflag [#allocation5], %s1136_s29 }
  0x47   : > { %393 = vrot.lane.b32.xlu0 %v391_v11, %s1010_s7  ;;  %395 = vrot.lane.b32.xlu1 %v392_v12, %s1010_s7  ;;  %s939_s7 = scalar_lea.vmem %s697_s5, 192 }
  0x48   : > { %p940_p11 = scmp.ne.s32.totalorder %s697_s5, %s939_s7 }
  0x4a   : > { %p941_p13 = pnand %p940_p11, %p1221_p12 }
  0x4b   : > { %471 = vrot.lane.b32.xlu0 %v391_v11, %s1011_s8  ;;  %473 = vrot.lane.b32.xlu1 %v392_v12, %s1011_s8  ;;  %s943_s8 = sshll.u32 %s1017_s16, 4  ;;  %s944_s8 = int_to_ptr.vmem [resolvable:$false] %s943_s8 }
  0x4c   : > { %p942_p1 = pneg %p941_p13  ;;  %p946_p3 = scmp.lt.s32.totalorder %s697_s5, %s944_s8 }
  0x4f   : > { %238 = vrot.lane.b32.xlu1 %v392_v12, %s1012_s10  ;;  %236 = vrot.lane.b32.xlu0 %v391_v11, %s1012_s10  ;;  %s945_s10 = scalar_lea.vmem %s944_s8, 384 }
  0x50   : > { %p947_p5 = scmp.lt.s32.totalorder %s945_s10, %s939_s7 }
  0x52   : > { %p948_p8 = por %p947_p5, %p946_p3 }
  0x53   : > { %277 = vrot.lane.b32.xlu1 %v825_v7, %s1013_s11  ;;  %275 = vrot.lane.b32.xlu0 %v824_v6, %s1013_s11 }
  0x54   : > { %p949_p10 = pnand %p948_p8, %p942_p1 }
  0x57   : > { %317 = vrot.lane.b32.xlu1 %v392_v12, %s1014_s17  ;;  %315 = vrot.lane.b32.xlu0 %v391_v11, %s1014_s17 }
  0x5b   : > { %537 = vperm.xlu0 %899, %v534_v15  }
  0xad   : > { %v510_v16 = vpop.permute.xlu0 %509  ;;  %v354_v17 = vpop.permute.xlu1 %353 }
  0xae   : > { %v513_v20 = vrot.slane %v510_v16, 4  ;;  %v357_v21 = vrot.slane %v354_v17, 4 }
  0xb1   : > { %v512_v18 = vpop.permute.xlu0 %511  ;;  %v356_v19 = vpop.permute.xlu1 %355 }
  0xb2   : > { %v514_v22 = vrot.slane %v512_v18, 4  ;;  %v358_v23 = vrot.slane %v356_v19, 4 }
  0xb4   : > { %v515_v24 = vsel %vm242_vm1, %v513_v20, %v514_v22  ;;  %v518_v25 = vsel %vm516_vm2, %v512_v18, %v514_v22  ;;  %v359_v26 = vsel %vm242_vm1, %v357_v21, %v358_v23  ;;  %v362_v27 = vsel %vm360_vm3, %v356_v19, %v358_v23  ;;  %v523_v21 = vld [vmem:[%s1208_s1] sm:$0x3] }
  0xb5   : > { %v517_v28 = vsel %vm516_vm2, %v510_v16, %v515_v24  ;;  %522 = vst [vmem:[#allocation2 + $0x38] sm:$0x3] %v518_v25  ;;  %v361_v29 = vsel %vm360_vm3, %v354_v17, %v359_v26  ;;  %366 = vst [vmem:[#allocation2 + $0x20] sm:$0x3] %v362_v27  ;;  %v432_v30 = vpop.permute.xlu0 %431  ;;  %v434_v31 = vpop.permute.xlu1 %433 }
  0xb6   : > { %521 = vst [vmem:[#allocation2 + $0x30] sm:$0x33] %v517_v28  ;;  %365 = vst [vmem:[#allocation2 + $0x18] sm:$0x33] %v361_v29  ;;  %v435_v32 = vrot.slane %v432_v30, 4  ;;  %v436_v33 = vrot.slane %v434_v31, 4 }
  0xb8   : > { %v437_v34 = vsel %vm242_vm1, %v435_v32, %v436_v33  ;;  %v440_v35 = vsel %vm438_vm4, %v434_v31, %v436_v33 }
  0xb9   : > { %v439_v36 = vsel %vm438_vm4, %v432_v30, %v437_v34  ;;  %444 = vst [vmem:[#allocation2 + $0x2c] sm:$0x3] %v440_v35  ;;  %v394_v37 = vpop.permute.xlu0 %393  ;;  %v396_v38 = vpop.permute.xlu1 %395 }
  0xba   : > { %443 = vst [vmem:[#allocation2 + $0x24] sm:$0x33] %v439_v36  ;;  %v397_v39 = vrot.slane %v394_v37, 4  ;;  %v398_v40 = vrot.slane %v396_v38, 4 }
  0xbc   : > { %v399_v41 = vsel %vm242_vm1, %v397_v39, %v398_v40  ;;  %v402_v42 = vsel %vm400_vm5, %v396_v38, %v398_v40  ;;  %v901_v43 = vld [vmem:[#allocation2 + $0x38] ss:$0 sps:$4 sm:$0x33]  }
  0xbd   : > { %v401_v44 = vsel %vm400_vm5, %v394_v37, %v399_v41  ;;  %406 = vst [vmem:[#allocation2 + $0x20] sm:$0xc] %v402_v42  ;;  %v472_v45 = vpop.permute.xlu0 %471  ;;  %v474_v46 = vpop.permute.xlu1 %473  ;;  %v532_v47 = vld [vmem:[#allocation2 + $0x30] sm:$0x33]  ;;  %v592_v51 = vsel %vm584_vm6, %v901_v43, 0 }
  0xbe   : > { %405 = vst [vmem:[#allocation2 + $0x18] sm:$0xcc] %v401_v44  ;;  %v475_v48 = vrot.slane %v472_v45, 4  ;;  %v476_v49 = vrot.slane %v474_v46, 4  ;;  %v799_v50 = vcombine.high %v532_v47, %v532_v47  ;;  %831 = vmatpush3.bf16.msra.mxu1 %v592_v51  ;;  %v798_v52 = vcombine.low %v532_v47, %v532_v47 }
  0xbf   : > { %832 = vmatprep.subr.bf16.mxu1 %v1008_v8 }
  0xc0   : > { %v477_v53 = vsel %vm242_vm1, %v475_v48, %v476_v49  ;;  %v480_v54 = vsel %vm478_vm7, %v474_v46, %v476_v49  ;;  %801 = vmatprep.subr.msk.bf16.mxu0 %vm584_vm6, %v799_v50  ;;  %v586_v56 = vsel %vm584_vm6, %v798_v52, 0 }
  0xc1   : > { %v479_v55 = vsel %vm478_vm7, %v472_v45, %v477_v53  ;;  %484 = vst [vmem:[#allocation2 + $0x2c] sm:$0xc] %v480_v54  ;;  %v239_v57 = vpop.permute.xlu1 %238  ;;  %v237_v58 = vpop.permute.xlu0 %236  ;;  %605 = vmatpush1.bf16.msra.mxu0 %v586_v56 }
  0xc2   : > { %483 = vst [vmem:[#allocation2 + $0x24] sm:$0xcc] %v479_v55  ;;  %v241_v59 = vrot.slane %v239_v57, 4  ;;  %v240_v60 = vrot.slane %v237_v58, 4 }
  0xc4   : > { %v246_v61 = vsel %vm244_vm8, %v239_v57, %v241_v59  ;;  %v243_v62 = vsel %vm242_vm1, %v240_v60, %v241_v59 }
  0xc5   : > { %250 = vst [vmem:[#allocation2 + $0x8] sm:$0xc] %v246_v61  ;;  %v245_v63 = vsel %vm244_vm8, %v237_v58, %v243_v62  ;;  %v278_v0 = vpop.permute.xlu1 %277  ;;  %v276_v1 = vpop.permute.xlu0 %275 }
  0xc6   : > { %249 = vst [vmem:[#allocation2] sm:$0xcc] %v245_v63  ;;  %v280_v2 = vrot.slane %v278_v0, 4  ;;  %v279_v3 = vrot.slane %v276_v1, 4 }
  0xc8   : > { %v284_v4 = vsel %vm282_vm9, %v278_v0, %v280_v2  ;;  %v281_v5 = vsel %vm242_vm1, %v279_v3, %v280_v2  ;;  %v903_v6 = vld [vmem:[#allocation2 + $0x20] ss:$12 sps:$4 sm:$0xff]  }
  0xc9   : > { %288 = vst [vmem:[#allocation2 + $0x14] sm:$0x3] %v284_v4  ;;  %v283_v7 = vsel %vm282_vm9, %v276_v1, %v281_v5  ;;  %v318_v9 = vpop.permute.xlu1 %317  ;;  %v316_v10 = vpop.permute.xlu0 %315  ;;  %v904_v11 = vld [vmem:[#allocation2 + $0x1c] ss:$12 sps:$4 sm:$0xff]   ;;  %v906_v12 = vld [vmem:[#allocation2 + $0x18] ss:$12 sps:$4 sm:$0xff]   ;;  %833 = vmatpush3.bf16.msra.mxu1 %v903_v6 }
  0xca   : > { %287 = vst [vmem:[#allocation2 + $0xc] sm:$0x33] %v283_v7  ;;  %v320_v13 = vrot.slane %v318_v9, 4  ;;  %v319_v14 = vrot.slane %v316_v10, 4  ;;  %606 = vmatprep.subr.bf16.mxu0 %v904_v11  ;;  %834 = vmatprep.subr.bf16.mxu1 %v1008_v8 }
  0xcb   : > { %607 = vmatpush1.bf16.msra.mxu0 %v906_v12 }
  0xcc   : > { %v324_v15 = vsel %vm322_vm10, %v318_v9, %v320_v13  ;;  %v321_v16 = vsel %vm242_vm1, %v319_v14, %v320_v13 }
  0xcd   : > { %328 = vst [vmem:[#allocation2 + $0x14] sm:$0xc] %v324_v15  ;;  %v323_v17 = vsel %vm322_vm10, %v316_v10, %v321_v16 }
  0xce   : > { %327 = vst [vmem:[#allocation2 + $0xc] sm:$0xcc] %v323_v17 }
  0xd4   : > { %v907_v18 = vld [vmem:[#allocation2 + $0x8] ss:$12 sps:$4 sm:$0xff]  }
  0xd5   : > { %v908_v19 = vld [vmem:[#allocation2 + $0x4] ss:$12 sps:$4 sm:$0xff]   ;;  %v910_v20 = vld [vmem:[#allocation2] ss:$12 sps:$4 sm:$0xff]   ;;  %835 = vmatpush3.bf16.msra.mxu1 %v907_v18 }
  0xd6   : > { %608 = vmatprep.subr.bf16.mxu0 %v908_v19  ;;  %v538_v22 = vpop.permute.xlu0 %537 }
  0xd7   : > { %609 = vmatpush1.bf16.msra.mxu0 %v910_v20 }
  0xd8   : > { %837 = vmatmul.mubr.msk.bf16.vlgmr.msra.gmra.mxu1 %vm580_vm11, %v523_v21 }
  0xda   : > { %802 = vmatmul.mubr.msk.bf16.vlgmr.msra.gmra.mxu0 %vm580_vm11, %v523_v21 }
 0x198   : > { %v669_v8 = vpop.f32.mrf.mxu1 }
 0x199   : > { %v670_v23 = vadd.f32 %v669_v8, %v538_v22 }
 0x19a   : > { %v628_v24 = vpop.f32.mrf.mxu0  ;;  %v838_v25 = vpop.f32.mrf.mxu1 }
 0x19b   : > { %680 = vst [vmem:[%s186_s28 + $0x8] sm:$0xf] %v670_v23  ;;  %v629_v28 = vadd.f32 %v628_v24, %v538_v22 }
 0x19c   : > { %v630_v26 = vpop.f32.mrf.mxu0  ;;  %v672_v27 = vpop.f32.mrf.mxu1 }
 0x19d   : > { %v631_v29 = vadd.f32 %v630_v26, %v538_v22 }
 0x19e   : > { %v632_v30 = vpop.f32.mrf.mxu0  ;;  %v839_v31 = vpop.f32.mrf.mxu1 }
 0x19f   : > { %v677_v32 = vcombine.low %v629_v28, %v631_v29 }
 0x1a0   : > { %v633_v33 = vpop.f32.mrf.mxu0 }
 0x1a1   : > { %679 = vst [vmem:[%s186_s28] sm:$0xff] %v677_v32 }
 0x1a2   : > { %952 = shalt.err (!%p949_p10)
}
 0x1a3   : > { %s953_s11 = scalar_lea.hbm %s1170_s6, 192  ;;  %s957_s19 = scalar_lea.hbm %s1210_s3, 384 }
 0x1a4   : > { %p954_p2 = scmp.ne.s32.totalorder %s1170_s6, %s953_s11  ;;  %p958_p7 = scmp.lt.s32.totalorder %s1170_s6, %s1210_s3 }
 0x1a5   : > { %p959_p0 = scmp.lt.s32.totalorder %s957_s19, %s953_s11 }
 0x1a6   : > { %p955_p4 = pnand %p954_p2, %p1221_p12 }
 0x1a7   : > { %p960_p6 = por %p959_p0, %p958_p7 }
 0x1a8   : > { %p956_p9 = pneg %p955_p4 }
 0x1aa   : > { %p961_p11 = pnand %p960_p6, %p956_p9 }
 0x1ac   : > { %964 = shalt.err (!%p961_p11)
}
 0x1ad   : > { %844 = dma.vmem_to_hbm [thread:$0]  (%p1221_p12), %s697_s5, 192, %s1170_s6, %s682_s23  }
 0x1ae PF: > { %s708_s26 = sand.u32 1, %s991_s12   ;;  %p1222_p13 = scmp.ne.s32.totalorder %s1216_s25, 0 }
 0x1af   : > { %p1223_p1 = scmp.ge.s32.totalorder %s1003_s15, 2  ;;  %s709_s27 = scalar_lea.sflag [#allocation5], %s708_s26 }
 0x1b1   : > { %p851_p3 = pnand %p1223_p1, %p1222_p13 }
 0x1b3   : > { %p852_p5 = pneg %p851_p3 }
 0x1b5   : > { %986 = dma.done.wait (%p852_p5), %s709_s27, 192  }
 0x1b6   : > { %988 = vsyncadd (%p852_p5), %s709_s27, 4294967104  ;;  %p16_p8 = scmp.ge.s32.totalorder %s1063_s18, 4   ;;  %s1224_s12 = smov %s995_s13 }
 0x1b7   : > { %s1225_s13 = smov %s999_s14  ;;  %s1226_s14 = smov %s1075_s21 }
 0x1b8   : > { %s1227_s15 = smov %s1063_s18  ;;  %18 = sbr.rel (!%p16_p8) target bundleno = 5 (0x5), region = 77 }
 0x1bd   :  { %714 = vsyncpa [#allocation4], 1 }
 0x1be   :  { %716 = vsyncpa [#allocation4 + $0x1], 1 }
 0x1bf   :  { %717 = vsyncpa [#allocation5], 1 }
 0x1c0   :  { %719 = vsyncpa [#allocation5 + $0x1], 1 }

</bundles_post_ra>
